<compile_context>
chip_gen: v5e
topology: v5e:2x2
jax: 0.10.0
libtpu: 0.0.40
codegen_flags: <defaults>
</compile_context>

<pallas_src>
import functools
import math

import numpy as np
import jax
import jax.numpy as jnp
from jax import lax
from jax.experimental import pallas as pl
from jax.experimental.pallas import tpu as pltpu


# ----------------------------- parameter setup (glue) -----------------------------
def _to_mel(hz):
    return 2595.0 * np.log10(1.0 + hz / 700.0)


def _to_hz(mel):
    return 700.0 * (10.0 ** (mel / 2595.0) - 1.0)


def make_sincconv_params(out_channels, kernel_size, sample_rate=16000,
                         min_low_hz=50, min_band_hz=50):
    """Deterministic init mirroring SincConv.__init__ (mel-spaced bands)."""
    if kernel_size % 2 == 0:
        kernel_size += 1
    low_hz = 30.0
    high_hz = sample_rate / 2 - (min_low_hz + min_band_hz)
    mel = np.linspace(_to_mel(low_hz), _to_mel(high_hz), out_channels + 1)
    hz = _to_hz(mel)
    low_hz_ = hz[:-1].reshape(-1, 1).astype(np.float32)            # (C, 1)
    band_hz_ = np.diff(hz).reshape(-1, 1).astype(np.float32)       # (C, 1)

    kh = kernel_size // 2
    n_lin = np.linspace(0.0, kernel_size / 2 - 1, num=kh)
    window_ = (0.54 - 0.46 * np.cos(2 * math.pi * n_lin / kernel_size)).astype(np.float32)
    n = (kernel_size - 1) / 2.0
    n_ = (2 * math.pi * np.arange(-n, 0) / sample_rate).reshape(1, -1).astype(np.float32)

    return (kernel_size,
            jnp.asarray(low_hz_), jnp.asarray(band_hz_),
            jnp.asarray(n_), jnp.asarray(window_.reshape(1, -1)))


def _round_up(x, m):
    return (x + m - 1) // m * m


# ------------------------- kernel 1: one-shot filter synthesis ---------------------
def sinc_filter_kernel(low_ref, band_ref, n_ref, nrev_ref, scale_ref, scalerev_ref,
                       o_ref, *, K, min_low_hz, min_band_hz, sample_rate):
    """Synthesize the (C_pad, K_pad) band-pass filter bank once (grid-invariant)."""
    Kh = n_ref.shape[1]
    low = min_low_hz + jnp.abs(low_ref[...])                                   # (C_pad, 1)
    high = jnp.clip(low + min_band_hz + jnp.abs(band_ref[...]),
                    min_low_hz, sample_rate / 2.0)                             # (C_pad, 1)
    band = high - low                                                          # (C_pad, 1)
    # Exact reciprocal (one-shot; keeps the strict f32 validation path tight).
    inv_denom = pl.reciprocal(2.0 * band)                                      # (C_pad, 1)

    n = n_ref[...]          # (1, Kh)  2*pi*t/fs, t < 0
    nrev = nrev_ref[...]    # (1, Kh)  reversed time grid
    # scale == window / (n/2) precomputed in the wrapper (folds two divides away).
    left = (jnp.sin(high * n) - jnp.sin(low * n)) * scale_ref[...]             # (C_pad, Kh)
    right = (jnp.sin(high * nrev) - jnp.sin(low * nrev)) * scalerev_ref[...]   # (C_pad, Kh)
    center = 2.0 * band                                                        # (C_pad, 1)

    o_ref[...] = jnp.zeros_like(o_ref)          # zero the K-padding columns
    o_ref[:, :Kh] = left * inv_denom
    o_ref[:, Kh:Kh + 1] = center * inv_denom
    o_ref[:, Kh + 1:K] = right * inv_denom


# --------------------- kernel 2: tiled MXU convolution (per tile) -------------------
def sinc_conv_mxu_kernel(filt_ref, x_hbm, o_ref, xwin_ref, patch_ref, sem, *,
                         K, dilation, compute_dtype):
    """One (batch b, time-tile j) output tile: halo DMA -> im2col -> MXU matmul."""
    K_pad, T_TILE = patch_ref.shape
    W_pad = xwin_ref.shape[1]

    b = pl.program_id(0)
    j = pl.program_id(1)
    start = pl.multiple_of(j * T_TILE, 128)          # T_TILE is a multiple of 128

    # Overlapping halo windows can't be expressed as a plain Blocked BlockSpec,
    # so x stays in HBM (pl.ANY) and the window is copied manually.
    cp = pltpu.make_async_copy(
        x_hbm.at[pl.ds(b, 1), pl.ds(start, W_pad)], xwin_ref, sem)
    cp.start()
    cp.wait()

    # im2col: patch[k, :] = x[start + k*dilation : start + k*dilation + T_TILE].
    # Rows k >= K multiply all-zero filter columns; fill them with valid data so
    # no uninitialized VMEM (possible NaN) ever reaches the MXU.
    def build_row(k, carry):
        kk = jnp.minimum(k, K - 1)
        patch_ref[pl.ds(k, 1), :] = xwin_ref[:, pl.ds(kk * dilation, T_TILE)]
        return carry

    lax.fori_loop(0, K_pad, build_row, 0, unroll=(K_pad <= 64))

    # One MXU matmul per tile: bf16 (or f32) inputs, f32 accumulation.
    o_ref[...] = jnp.dot(
        filt_ref[...].astype(compute_dtype),
        patch_ref[...].astype(compute_dtype),
        preferred_element_type=jnp.float32)


# ------------------------------------ wrapper --------------------------------------
def sinc_conv(waveforms, low_hz_, band_hz_, n_, window_, *, kernel_size,
              stride=1, padding=0, dilation=1, sample_rate=16000,
              min_low_hz=50, min_band_hz=50,
              compute_dtype=jnp.bfloat16, time_tile=512):
    B, c_in, T = waveforms.shape
    assert c_in == 1, "SincConv only supports one input channel"
    K = kernel_size
    C = low_hz_.shape[0]

    x2 = waveforms[:, 0, :].astype(jnp.float32)                  # (B, T)
    if padding:
        x2 = jnp.pad(x2, ((0, 0), (padding, padding)))
    Tp = x2.shape[1]
    span = dilation * (K - 1)
    T_dense = Tp - span                       # stride-1 (dense) output length
    assert T_dense >= 1, "input too short for this kernel size / dilation"
    T_out = (Tp - span - 1) // stride + 1

    # ---- tiling: lane-dense 128-multiple time tiles; modest VMEM (v7x-safe) ----
    T_TILE = min(_round_up(time_tile, 128), _round_up(T_dense, 128))
    num_tiles = -(-T_dense // T_TILE)
    C_pad = _round_up(C, 8)                   # sublane multiple for the f32 output
    K_pad = _round_up(K, 16)                  # bf16-tile-friendly contraction dim
    W_pad = _round_up(T_TILE + span, 128)     # halo window per time tile
    T_x_pad = (num_tiles - 1) * T_TILE + W_pad
    x2 = jnp.pad(x2, ((0, 0), (0, T_x_pad - Tp)))

    # ---- filter synthesis inputs (pad channels with benign values: band > 0) ----
    pad_rows = C_pad - C
    lowp = jnp.pad(low_hz_.astype(jnp.float32), ((0, pad_rows), (0, 0)),
                   constant_values=100.0)
    bandp = jnp.pad(band_hz_.astype(jnp.float32), ((0, pad_rows), (0, 0)),
                    constant_values=100.0)
    n32 = n_.astype(jnp.float32)
    nrev = n32[:, ::-1]
    scale = (2.0 * window_.astype(jnp.float32)) / n32        # == window / (n/2)
    scalerev = scale[:, ::-1]

    def full_spec(shape):
        nd = len(shape)
        return pl.BlockSpec(shape, lambda i, _nd=nd: (0,) * _nd)

    filt = pl.pallas_call(
        functools.partial(sinc_filter_kernel, K=K,
                          min_low_hz=float(min_low_hz),
                          min_band_hz=float(min_band_hz),
                          sample_rate=float(sample_rate)),
        out_shape=jax.ShapeDtypeStruct((C_pad, K_pad), jnp.float32),
        grid=(1,),
        in_specs=[full_spec(lowp.shape), full_spec(bandp.shape),
                  full_spec(n32.shape), full_spec(nrev.shape),
                  full_spec(scale.shape), full_spec(scalerev.shape)],
        out_specs=full_spec((C_pad, K_pad)),
    )(lowp, bandp, n32, nrev, scale, scalerev)

    # ---- tiled MXU convolution over a (batch, time-tile) grid ----
    conv = pl.pallas_call(
        functools.partial(sinc_conv_mxu_kernel, K=K, dilation=dilation,
                          compute_dtype=compute_dtype),
        out_shape=jax.ShapeDtypeStruct((B, C_pad, num_tiles * T_TILE), jnp.float32),
        grid=(B, num_tiles),
        in_specs=[pl.BlockSpec((C_pad, K_pad), lambda b, j: (0, 0)),   # resident filter
                  pl.BlockSpec(memory_space=pl.ANY)],                  # raw HBM waveform
        out_specs=pl.BlockSpec((None, C_pad, T_TILE), lambda b, j: (b, 0, j)),
        scratch_shapes=[pltpu.VMEM((1, W_pad), jnp.float32),        # halo window
                        pltpu.VMEM((K_pad, T_TILE), jnp.float32),   # im2col patch
                        pltpu.SemaphoreType.DMA],
        compiler_params=pltpu.CompilerParams(
            dimension_semantics=("parallel", "parallel"),
            vmem_limit_bytes=32 * 1024 * 1024),
    )(filt, x2)

    # Un-pad channels/time; stride>1 is a dense conv + decimation (keeps the
    # in-kernel loads contiguous on the lane axis).
    y = conv[:, :C, :T_dense]
    if stride > 1:
        y = y[:, :, ::stride]
    return y[:, :, :T_out]


# ------------------------------ pure-JAX reference ---------------------------------
def sinc_conv_ref(waveforms, low_hz_, band_hz_, n_, window_, *, kernel_size,
                  stride=1, padding=0, dilation=1, sample_rate=16000,
                  min_low_hz=50, min_band_hz=50):
    low = min_low_hz + jnp.abs(low_hz_)
    high = jnp.clip(low + min_band_hz + jnp.abs(band_hz_), min_low_hz, sample_rate / 2)
    band = (high - low)[:, 0]
    ftl = low @ n_
    fth = high @ n_
    bp_left = (jnp.sin(fth) - jnp.sin(ftl)) / (n_ / 2) * window_
    bp_center = 2 * band[:, None]
    bp_right = jnp.flip(bp_left, axis=1)
    bp = jnp.concatenate([bp_left, bp_center, bp_right], axis=1) / (2 * band[:, None])
    filt = bp.reshape(low_hz_.shape[0], 1, kernel_size)
    return jax.lax.conv_general_dilated(
        waveforms.astype(jnp.float32), filt, window_strides=(stride,),
        padding=[(padding, padding)], rhs_dilation=(dilation,),
        dimension_numbers=('NCH', 'OIH', 'NCH'),
        precision=jax.lax.Precision.HIGHEST)


# -------------------------------------- main ---------------------------------------
if __name__ == "__main__":
    out_channels = 4
    kernel_size_req = 16          # even -> module bumps it to 17
    sample_rate = 16000
    B, T = 2, 64

    K, low_hz_, band_hz_, n_, window_ = make_sincconv_params(
        out_channels, kernel_size_req, sample_rate=sample_rate)

    key = jax.random.PRNGKey(0)
    waveforms = jax.random.normal(key, (B, 1, T), dtype=jnp.float32)

    y_ref = sinc_conv_ref(waveforms, low_hz_, band_hz_, n_, window_,
                          kernel_size=K, stride=1, padding=0, dilation=1,
                          sample_rate=sample_rate)
    y_ref = jax.block_until_ready(y_ref)

    # Exact (f32 MXU) path -- strict check of the kernel semantics.
    y_f32 = sinc_conv(waveforms, low_hz_, band_hz_, n_, window_,
                      kernel_size=K, stride=1, padding=0, dilation=1,
                      sample_rate=sample_rate, compute_dtype=jnp.float32)
    y_f32 = jax.block_until_ready(y_f32)
    assert y_f32.shape == (B, out_channels, T - K + 1), y_f32.shape
    np.testing.assert_allclose(np.asarray(y_f32), np.asarray(y_ref),
                               rtol=2e-3, atol=2e-3)

    # Fast default path: bf16 MXU operands, f32 accumulation (looser tolerance).
    y_bf16 = sinc_conv(waveforms, low_hz_, band_hz_, n_, window_,
                       kernel_size=K, stride=1, padding=0, dilation=1,
                       sample_rate=sample_rate)
    y_bf16 = jax.block_until_ready(y_bf16)
    np.testing.assert_allclose(np.asarray(y_bf16), np.asarray(y_ref),
                               rtol=5e-2, atol=5e-2)

    # stride / padding path (dense conv + decimation), f32 for a strict check.
    y_s = sinc_conv(waveforms, low_hz_, band_hz_, n_, window_,
                    kernel_size=K, stride=2, padding=8, dilation=1,
                    sample_rate=sample_rate, compute_dtype=jnp.float32)
    y_s = jax.block_until_ready(y_s)
    y_s_ref = sinc_conv_ref(waveforms, low_hz_, band_hz_, n_, window_,
                            kernel_size=K, stride=2, padding=8, dilation=1,
                            sample_rate=sample_rate)
    y_s_ref = jax.block_until_ready(y_s_ref)
    assert y_s.shape == y_s_ref.shape, (y_s.shape, y_s_ref.shape)
    np.testing.assert_allclose(np.asarray(y_s), np.asarray(y_s_ref),
                               rtol=2e-3, atol=2e-3)

    print("KERNEL_OK")
</pallas_src>

<mosaic_0001>
module attributes {stable_mosaic.version = 11 : i64} {
  func.func @sinc_filter_kernel(%arg0: i32, %arg1: memref<8x1xf32, #tpu.memory_space<vmem>>, %arg2: memref<8x1xf32, #tpu.memory_space<vmem>>, %arg3: memref<1x8xf32, #tpu.memory_space<vmem>>, %arg4: memref<1x8xf32, #tpu.memory_space<vmem>>, %arg5: memref<1x8xf32, #tpu.memory_space<vmem>>, %arg6: memref<1x8xf32, #tpu.memory_space<vmem>>, %arg7: memref<8x32xf32, #tpu.memory_space<vmem>>) attributes {dimension_semantics = [#tpu.dimension_semantics<arbitrary>], iteration_bounds = array<i64: 1>, scalar_prefetch = 0 : i64, scratch_operands = 0 : i64, tpu.core_type = #tpu.core_type<tc>, window_params = [{pipeline_mode = #tpu.pipeline_mode<synchronous>, transform_indices = @transform_0, window_bounds = array<i64: 8, 1>}, {pipeline_mode = #tpu.pipeline_mode<synchronous>, transform_indices = @transform_1, window_bounds = array<i64: 8, 1>}, {pipeline_mode = #tpu.pipeline_mode<synchronous>, transform_indices = @transform_2, window_bounds = array<i64: 1, 8>}, {pipeline_mode = #tpu.pipeline_mode<synchronous>, transform_indices = @transform_3, window_bounds = array<i64: 1, 8>}, {pipeline_mode = #tpu.pipeline_mode<synchronous>, transform_indices = @transform_4, window_bounds = array<i64: 1, 8>}, {pipeline_mode = #tpu.pipeline_mode<synchronous>, transform_indices = @transform_5, window_bounds = array<i64: 1, 8>}, {pipeline_mode = #tpu.pipeline_mode<synchronous>, transform_indices = @transform_6, window_bounds = array<i64: 8, 32>}]} {
    %c0 = arith.constant 0 : index
    %c0_0 = arith.constant 0 : index
    %0 = vector.load %arg1[%c0, %c0_0] : memref<8x1xf32, #tpu.memory_space<vmem>>, vector<8x1xf32>
    %1 = math.absf %0 : vector<8x1xf32>
    %cst = arith.constant 5.000000e+01 : f32
    %2 = vector.broadcast %cst : f32 to vector<8x1xf32>
    %3 = arith.addf %2, %1 : vector<8x1xf32>
    %cst_1 = arith.constant 5.000000e+01 : f32
    %4 = vector.broadcast %cst_1 : f32 to vector<8x1xf32>
    %5 = arith.addf %3, %4 : vector<8x1xf32>
    %c0_2 = arith.constant 0 : index
    %c0_3 = arith.constant 0 : index
    %6 = vector.load %arg2[%c0_2, %c0_3] : memref<8x1xf32, #tpu.memory_space<vmem>>, vector<8x1xf32>
    %7 = math.absf %6 : vector<8x1xf32>
    %8 = arith.addf %5, %7 : vector<8x1xf32>
    %cst_4 = arith.constant 5.000000e+01 : f32
    %cst_5 = arith.constant 8.000000e+03 : f32
    %9 = vector.broadcast %cst_4 : f32 to vector<8x1xf32>
    %10 = arith.maximumf %9, %8 : vector<8x1xf32>
    %11 = vector.broadcast %cst_5 : f32 to vector<8x1xf32>
    %12 = arith.minimumf %11, %10 : vector<8x1xf32>
    %13 = arith.subf %12, %3 : vector<8x1xf32>
    %cst_6 = arith.constant 2.000000e+00 : f32
    %14 = vector.broadcast %cst_6 : f32 to vector<8x1xf32>
    %15 = arith.mulf %14, %13 : vector<8x1xf32>
    %16 = tpu.reciprocal %15 : vector<8x1xf32> -> vector<8x1xf32>
    %c0_7 = arith.constant 0 : index
    %c0_8 = arith.constant 0 : index
    %17 = vector.load %arg3[%c0_7, %c0_8] : memref<1x8xf32, #tpu.memory_space<vmem>>, vector<1x8xf32>
    %c0_9 = arith.constant 0 : index
    %c0_10 = arith.constant 0 : index
    %18 = vector.load %arg4[%c0_9, %c0_10] : memref<1x8xf32, #tpu.memory_space<vmem>>, vector<1x8xf32>
    %19 = vector.broadcast %12 : vector<8x1xf32> to vector<8x8xf32>
    %20 = vector.broadcast %17 : vector<1x8xf32> to vector<8x8xf32>
    %21 = arith.mulf %19, %20 : vector<8x8xf32>
    %22 = math.sin %21 : vector<8x8xf32>
    %23 = vector.broadcast %3 : vector<8x1xf32> to vector<8x8xf32>
    %24 = vector.broadcast %17 : vector<1x8xf32> to vector<8x8xf32>
    %25 = arith.mulf %23, %24 : vector<8x8xf32>
    %26 = math.sin %25 : vector<8x8xf32>
    %27 = arith.subf %22, %26 : vector<8x8xf32>
    %c0_11 = arith.constant 0 : index
    %c0_12 = arith.constant 0 : index
    %28 = vector.load %arg5[%c0_11, %c0_12] : memref<1x8xf32, #tpu.memory_space<vmem>>, vector<1x8xf32>
    %29 = vector.broadcast %28 : vector<1x8xf32> to vector<8x8xf32>
    %30 = arith.mulf %27, %29 : vector<8x8xf32>
    %31 = vector.broadcast %12 : vector<8x1xf32> to vector<8x8xf32>
    %32 = vector.broadcast %18 : vector<1x8xf32> to vector<8x8xf32>
    %33 = arith.mulf %31, %32 : vector<8x8xf32>
    %34 = math.sin %33 : vector<8x8xf32>
    %35 = vector.broadcast %3 : vector<8x1xf32> to vector<8x8xf32>
    %36 = vector.broadcast %18 : vector<1x8xf32> to vector<8x8xf32>
    %37 = arith.mulf %35, %36 : vector<8x8xf32>
    %38 = math.sin %37 : vector<8x8xf32>
    %39 = arith.subf %34, %38 : vector<8x8xf32>
    %c0_13 = arith.constant 0 : index
    %c0_14 = arith.constant 0 : index
    %40 = vector.load %arg6[%c0_13, %c0_14] : memref<1x8xf32, #tpu.memory_space<vmem>>, vector<1x8xf32>
    %41 = vector.broadcast %40 : vector<1x8xf32> to vector<8x8xf32>
    %42 = arith.mulf %39, %41 : vector<8x8xf32>
    %cst_15 = arith.constant 2.000000e+00 : f32
    %43 = vector.broadcast %cst_15 : f32 to vector<8x1xf32>
    %44 = arith.mulf %43, %13 : vector<8x1xf32>
    %cst_16 = arith.constant 0.000000e+00 : f32
    %45 = vector.broadcast %cst_16 : f32 to vector<8x32xf32>
    %c0_17 = arith.constant 0 : index
    %c0_18 = arith.constant 0 : index
    %46 = vector.load %arg7[%c0_17, %c0_18] : memref<8x32xf32, #tpu.memory_space<vmem>>, vector<8x32xf32>
    tpu.vector_store %arg7[%c0_17, %c0_18], %45 {strides = array<i32>} : memref<8x32xf32, #tpu.memory_space<vmem>>, vector<8x32xf32>,
    %47 = vector.broadcast %16 : vector<8x1xf32> to vector<8x8xf32>
    %48 = arith.mulf %30, %47 : vector<8x8xf32>
    %c0_19 = arith.constant 0 : index
    %c0_20 = arith.constant 0 : index
    %49 = vector.load %arg7[%c0_19, %c0_20] : memref<8x32xf32, #tpu.memory_space<vmem>>, vector<8x8xf32>
    tpu.vector_store %arg7[%c0_19, %c0_20], %48 {strides = array<i32>} : memref<8x32xf32, #tpu.memory_space<vmem>>, vector<8x8xf32>,
    %50 = arith.mulf %44, %16 : vector<8x1xf32>
    %c0_21 = arith.constant 0 : index
    %c8 = arith.constant 8 : index
    %51 = vector.load %arg7[%c0_21, %c8] : memref<8x32xf32, #tpu.memory_space<vmem>>, vector<8x1xf32>
    tpu.vector_store %arg7[%c0_21, %c8], %50 {strides = array<i32>} : memref<8x32xf32, #tpu.memory_space<vmem>>, vector<8x1xf32>,
    %52 = vector.broadcast %16 : vector<8x1xf32> to vector<8x8xf32>
    %53 = arith.mulf %42, %52 : vector<8x8xf32>
    %c0_22 = arith.constant 0 : index
    %c9 = arith.constant 9 : index
    %54 = vector.load %arg7[%c0_22, %c9] : memref<8x32xf32, #tpu.memory_space<vmem>>, vector<8x8xf32>
    tpu.vector_store %arg7[%c0_22, %c9], %53 {strides = array<i32>} : memref<8x32xf32, #tpu.memory_space<vmem>>, vector<8x8xf32>,
    return
  }
  func.func @transform_0(%arg0: i32) -> (i32, i32) {
    %c0_i32 = arith.constant 0 : i32
    %c0_i32_0 = arith.constant 0 : i32
    %c0_i32_1 = arith.constant 0 : i32
    return %c0_i32, %c0_i32_0 : i32, i32
  }
  func.func @transform_1(%arg0: i32) -> (i32, i32) {
    %c0_i32 = arith.constant 0 : i32
    %c0_i32_0 = arith.constant 0 : i32
    %c0_i32_1 = arith.constant 0 : i32
    return %c0_i32, %c0_i32_0 : i32, i32
  }
  func.func @transform_2(%arg0: i32) -> (i32, i32) {
    %c0_i32 = arith.constant 0 : i32
    %c0_i32_0 = arith.constant 0 : i32
    %c0_i32_1 = arith.constant 0 : i32
    return %c0_i32, %c0_i32_0 : i32, i32
  }
  func.func @transform_3(%arg0: i32) -> (i32, i32) {
    %c0_i32 = arith.constant 0 : i32
    %c0_i32_0 = arith.constant 0 : i32
    %c0_i32_1 = arith.constant 0 : i32
    return %c0_i32, %c0_i32_0 : i32, i32
  }
  func.func @transform_4(%arg0: i32) -> (i32, i32) {
    %c0_i32 = arith.constant 0 : i32
    %c0_i32_0 = arith.constant 0 : i32
    %c0_i32_1 = arith.constant 0 : i32
    return %c0_i32, %c0_i32_0 : i32, i32
  }
  func.func @transform_5(%arg0: i32) -> (i32, i32) {
    %c0_i32 = arith.constant 0 : i32
    %c0_i32_0 = arith.constant 0 : i32
    %c0_i32_1 = arith.constant 0 : i32
    return %c0_i32, %c0_i32_0 : i32, i32
  }
  func.func @transform_6(%arg0: i32) -> (i32, i32) {
    %c0_i32 = arith.constant 0 : i32
    %c0_i32_0 = arith.constant 0 : i32
    %c0_i32_1 = arith.constant 0 : i32
    return %c0_i32, %c0_i32_0 : i32, i32
  }
}

</mosaic_0001>

<bundles_post_ra>
// kernel: tpu_custom_call.1
= control target key start
LH: loop header
LB: loop body
LE: loop exit
PB: predicated region body
PF: predicated region fallthrough
CT: control target
= control target key end

     0   :  { %v800_v2 = vmov 0   ;;  %s1342_s0 = inlined_call_operand.vmem [shape: f32[8,1], index: 0, kind: input, shape index: {}]   ;;  %s1343_s1 = inlined_call_operand.vmem [shape: f32[8,1], index: 1, kind: input, shape index: {}]   ;;  %s1344_s2 = inlined_call_operand.vmem [shape: f32[1,8], index: 2, kind: input, shape index: {}]   ;;  %s1345_s3 = inlined_call_operand.vmem [shape: f32[1,8], index: 3, kind: input, shape index: {}]   ;;  %s1346_s4 = inlined_call_operand.vmem [shape: f32[1,8], index: 4, kind: input, shape index: {}]   ;;  %s1347_s5 = inlined_call_operand.vmem [shape: f32[1,8], index: 5, kind: input, shape index: {}]   ;;  %s1348_s6 = inlined_call_operand.hbm [shape: f32[8,32], index: 6, kind: output, shape index: {}]  }
   0x1   :  { %v24_v0 = vld [vmem:[%s1342_s0] sm:$0xff]  ;;  %766 = vset.pattern.permute.xlu0 %v800_v2  ;;  %767 = vset.pattern.permute.xlu1 %v800_v2 }
   0x2   :  { %v28_v1 = vld [vmem:[%s1343_s1] sm:$0xff]  ;;  %v25_v3 = vand.u32 2147483647, %v24_v0 }
   0x3   :  { %v29_v5 = vand.u32 2147483647, %v28_v1 }
   0x4   :  { %v26_v4 = vadd.f32 50.0, %v25_v3 }
   0x6   :  { %v27_v6 = vadd.f32 50.0, %v26_v4 }
   0x7   :  { %11 = vsyncpa [#allocation3], 0  ;;  %v768_v23 = vld [vmem:[%s1344_s2] ss:$0 sm:$0xff]  ;;  %v801_v54 = vmov 683565275  }
   0x8   :  { %v30_v7 = vadd.f32 %v29_v5, %v27_v6  ;;  %v862_v24 = vld [vmem:[%s1345_s3] ss:$0 sm:$0xff]  ;;  %v802_v56 = vmov 2475754826   ;;  %v803_v60 = vmov 2131351028  }
   0x9   :  { %v804_v63 = vmov 2102212464   ;;  %v805_v3 = vmov 920167782   ;;  %v806_v6 = vmov 1326507024  }
   0xa   :  { %v31_v8 = vmax.f32 %v30_v7, 50.0  ;;  %s807_s2 = smov 8   ;;  %s809_s29 = smov 9  }
   0xb   :  { %s810_s30 = smov [#allocation2]   ;;  %s734_s10 = sshll.u32 %s1348_s6, 4  ;;  %s735_s10 = int_to_ptr.hbm [resolvable:$true] %s734_s10 }
   0xc   :  { %v32_v9 = vmin.f32 %v31_v8, 8000.0  ;;  %s732_s7 = sshll.u32 %s810_s30, 4  ;;  %s733_s7 = int_to_ptr.vmem [resolvable:$true] %s732_s7 }
   0xe   :  { %53 = vperm.xlu0 %766, %v32_v9   ;;  %v33_v10 = vsub.f32 %v32_v9, %v26_v4 }
  0x10   :  { %v34_v11 = vmul.f32 2.0, %v33_v10 }
  0x12   :  { %772 = vrcp.f32 %v34_v11  ;;  %v46_v14 = vand.u32 2147483648, %v34_v11  ;;  %vm40_vm0 = vweird.f32 %v34_v11  ;;  %v44_v16 = vand.u32 2147483647, %v34_v11 }
  0x14   :  { %v47_v18 = vor.u32 1.1754944e-38, %v46_v14  ;;  %vm45_vm3 = vcmp.eq.f32.partialorder %v44_v16, 8.507059e+37 }
  0x16   :  { %217 = vperm.xlu0 %766, %v26_v4  }
  0x18   :  { %v773_v12 = vpop.eup %772 }
  0x19   :  { %v36_v13 = vmul.f32 %v773_v12, %v34_v11  ;;  %vm41_vm1 = vweird.f32 %v773_v12 }
  0x1a   :  { %vm42_vm2 = vmor %vm40_vm0, %vm41_vm1 }
  0x1b   :  { %v37_v15 = vsub.f32 1.0, %v36_v13 }
  0x1d   :  { %v38_v17 = vmul.f32 %v773_v12, %v37_v15 }
  0x1f   :  { %v39_v19 = vadd.f32 %v773_v12, %v38_v17 }
  0x21   :  { %v43_v20 = vsel %vm42_vm2, %v773_v12, %v39_v19 }
  0x22   :  { %v48_v21 = vsel %vm45_vm3, %v47_v18, %v43_v20 }
  0x23   :  { %707 = vperm.xlu1 %767, %v48_v21   ;;  %v854_v22 = vmul.f32 %v48_v21, %v34_v11 }
  0x2b   :  { %715 = vrot.lane.b32.xlu1 %v854_v22, %s807_s2 }
  0x80   :  { %v54_v25 = vpop.permute.xlu0 %53 }
  0x81   :  { %v864_v26 = vmul.f32 %v768_v23, %v54_v25  ;;  %v867_v27 = vmul.f32 %v862_v24, %v54_v25 }
  0x83   :  { %v60_v28 = vand.u32 2147483647, %v864_v26  ;;  %v63_v29 = vand.u32 2139095040, %v864_v26  ;;  %v386_v30 = vand.u32 2147483647, %v867_v27  ;;  %v389_v31 = vand.u32 2139095040, %v867_v27 }
  0x85   :  { %v64_v32 = vshrl.u32 %v63_v29, 23  ;;  %v67_v33 = vand.u32 8388607, %v60_v28  ;;  %v390_v34 = vshrl.u32 %v389_v31, 23  ;;  %v393_v35 = vand.u32 8388607, %v386_v30 }
  0x87   :  { %v743_v36 = vadd.s32 4294967169, %v64_v32  ;;  %v68_v37 = vor.u32 8388608, %v67_v33  ;;  %v749_v38 = vadd.s32 4294967169, %v390_v34  ;;  %v394_v39 = vor.u32 8388608, %v393_v35 }
  0x88   :  { %v879_v43 = vpop.permute.xlu0 %217 }
  0x89   :  { %v70_v40 = vadd.s32 1, %v743_v36  ;;  %v396_v41 = vadd.s32 1, %v749_v38  ;;  %v877_v42 = vshll.u32 %v68_v37, 8  ;;  %v881_v45 = vshll.u32 %v394_v39, 8 }
  0x8a   :  { %v884_v48 = vmul.f32 %v768_v23, %v879_v43 }
  0x8b   :  { %vm71_vm4 = vcmp.gt.s32.totalorder %v70_v40, 0  ;;  %vm397_vm5 = vcmp.gt.s32.totalorder %v396_v41, 0  ;;  %v887_v50 = vand.u32 65535, %v877_v42  ;;  %v890_v51 = vshrl.u32 %v877_v42, 16 }
  0x8c   :  { %v72_v44 = vsel %vm71_vm4, %v70_v40, 0  ;;  %v398_v47 = vsel %vm397_vm5, %v396_v41, 0  ;;  %v899_v58 = vand.u32 65535, %v881_v45 }
  0x8d   :  { %v74_v46 = vand.u32 31, %v72_v44  ;;  %v892_v52 = vand.u32 31, %v398_v47  ;;  %v894_v53 = vshrl.u32 %v72_v44, 5  ;;  %v941_v40 = vshrl.u32 %v398_v47, 5 }
  0x8f   :  { %v75_v49 = vsub.s32 32, %v74_v46  ;;  %v77_v55 = vshll.u32 %v801_v54, %v74_v46  ;;  %v80_v57 = vshll.u32 %v802_v56, %v74_v46  ;;  %v83_v62 = vshll.u32 %v803_v60, %v74_v46 }
  0x90   :  { %v86_v1 = vshll.u32 %v804_v63, %v74_v46  ;;  %v89_v5 = vshll.u32 %v805_v3, %v74_v46  ;;  %v910_v11 = vsub.s32 32, %v892_v52  ;;  %vm92_vm6 = vcmp.lt.s32.totalorder %v894_v53, 1 }
  0x91   :  { %v78_v59 = vshrl.u32 %v802_v56, %v75_v49  ;;  %v81_v61 = vshrl.u32 %v803_v60, %v75_v49  ;;  %v84_v0 = vshrl.u32 %v804_v63, %v75_v49  ;;  %v87_v4 = vshrl.u32 %v805_v3, %v75_v49 }
  0x92   :  { %v90_v7 = vshrl.u32 %v806_v6, %v75_v49  ;;  %vm93_vm7 = vcmp.lt.s32.totalorder %v894_v53, 2  ;;  %v76_v14 = vshrl.u32 %v801_v54, %v75_v49  ;;  %vm95_vm8 = vcmp.lt.s32.totalorder %v894_v53, 4 }
  0x93   :  { %v79_v8 = vor.u32 %v78_v59, %v77_v55  ;;  %v82_v9 = vor.u32 %v81_v61, %v80_v57  ;;  %v85_v10 = vor.u32 %v84_v0, %v83_v62  ;;  %v88_v12 = vor.u32 %v87_v4, %v86_v1 }
  0x94   :  { %v91_v13 = vor.u32 %v90_v7, %v89_v5  ;;  %vm94_vm9 = vcmp.lt.s32.totalorder %v894_v53, 3  ;;  %v403_v19 = vshll.u32 %v801_v54, %v892_v52  ;;  %v404_v25 = vshrl.u32 %v802_v56, %v910_v11 }
  0x95   :  { %v100_v15 = vsel %vm92_vm6, %v79_v8, %v82_v9  ;;  %v104_v16 = vsel %vm92_vm6, %v82_v9, %v85_v10  ;;  %v101_v17 = vsel %vm95_vm8, %v88_v12, 920167782  ;;  %v97_v20 = vsel %vm95_vm8, %v85_v10, 2102212464 }
  0x96   :  { %v105_v18 = vsel %vm95_vm8, %v91_v13, 1326507024  ;;  %v102_v21 = vsel %vm94_vm9, %v85_v10, %v101_v17  ;;  %v406_v32 = vshll.u32 %v802_v56, %v892_v52  ;;  %v407_v33 = vshrl.u32 %v803_v60, %v910_v11 }
  0x97   :  { %v106_v23 = vsel %vm94_vm9, %v88_v12, %v105_v18  ;;  %v103_v29 = vsel %vm93_vm7, %v100_v15, %v102_v21  ;;  %v96_v38 = vsel %vm92_vm6, %v76_v14, %v79_v8  ;;  %v98_v39 = vsel %vm94_vm9, %v82_v9, %v97_v20 }
  0x98   :  { %v107_v31 = vsel %vm93_vm7, %v104_v16, %v106_v23  ;;  %v133_v36 = vand.u32 65535, %v103_v29  ;;  %v134_v37 = vshrl.u32 %v103_v29, 16  ;;  %v943_v41 = vor.u32 %v404_v25, %v403_v19 }
  0x99   :  { %v111_v34 = vand.u32 65535, %v107_v31  ;;  %v112_v35 = vshrl.u32 %v107_v31, 16  ;;  %v947_v49 = vor.u32 %v407_v33, %v406_v32  ;;  %v410_v55 = vshrl.u32 %v804_v63, %v910_v11 }
  0x9a   :  { %v136_v59 = vmul.u32 %v134_v37, %v887_v50  ;;  %v137_v61 = vmul.u32 %v133_v36, %v890_v51  ;;  %v409_v47 = vshll.u32 %v803_v60, %v892_v52  ;;  %v135_v1 = vmul.u32 %v133_v36, %v887_v50 }
  0x9b   :  { %v114_v44 = vmul.u32 %v112_v35, %v887_v50  ;;  %v115_v46 = vmul.u32 %v111_v34, %v890_v51  ;;  %v113_v57 = vmul.u32 %v111_v34, %v887_v50  ;;  %v116_v62 = vmul.u32 %v112_v35, %v890_v51 }
  0x9c   :  { %v138_v4 = vmul.u32 %v134_v37, %v890_v51  ;;  %v139_v9 = vshll.u32 %v136_v59, 16  ;;  %v141_v12 = vshll.u32 %v137_v61, 16  ;;  %v959_v13 = vor.u32 %v410_v55, %v409_v47 }
  0x9d   :  { %v117_v0 = vshll.u32 %v114_v44, 16  ;;  %v118_v5 = vshrl.u32 %v114_v44, 16  ;;  %v119_v7 = vshll.u32 %v115_v46, 16  ;;  %v120_v8 = vshrl.u32 %v115_v46, 16 }
  0x9e   :  { %vm143_vm11 = vc.u32 %v135_v1, %v139_v9  ;;  %v145_v15 = vadd.s32 %v139_v9, %v135_v1  ;;  %v413_v16 = vshrl.u32 %v805_v3, %v910_v11  ;;  %v412_v51 = vshll.u32 %v804_v63, %v892_v52 }
  0x9f   :  { %vm121_vm10 = vc.u32 %v113_v57, %v117_v0  ;;  %v123_v10 = vadd.s32 %v117_v0, %v113_v57  ;;  %v144_v50 = vsel %vm143_vm11, 1, %v800_v2  ;;  %v415_v20 = vshll.u32 %v805_v3, %v892_v52 }
  0xa0   :  { %v122_v14 = vsel %vm121_vm10, 1, %v800_v2  ;;  %v146_v19 = vadd.s32 %v144_v50, %v138_v4  ;;  %vm147_vm13 = vc.u32 %v145_v15, %v141_v12  ;;  %v414_v25 = vor.u32 %v413_v16, %v412_v51 }
  0xa1   :  { %v124_v17 = vadd.s32 %v122_v14, %v116_v62  ;;  %vm125_vm12 = vc.u32 %v123_v10, %v119_v7  ;;  %v148_v23 = vsel %vm147_vm13, 1, %v800_v2  ;;  %v416_v29 = vshrl.u32 %v806_v6, %v910_v11 }
  0xa2   :  { %v126_v18 = vsel %vm125_vm12, 1, %v800_v2  ;;  %v140_v31 = vshrl.u32 %v136_v59, 16  ;;  %v142_v32 = vshrl.u32 %v137_v61, 16  ;;  %v973_v33 = vadd.s32 %v145_v15, %v141_v12 }
  0xa3   :  { %v128_v21 = vadd.s32 %v126_v18, %v124_v17  ;;  %v150_v34 = vadd.s32 %v148_v23, %v146_v19  ;;  %v417_v36 = vor.u32 %v416_v29, %v415_v20  ;;  %vm418_vm14 = vcmp.lt.s32.totalorder %v941_v40, 1 }
  0xa4   :  { %vm421_vm15 = vcmp.lt.s32.totalorder %v941_v40, 4  ;;  %vm420_vm0 = vcmp.lt.s32.totalorder %v941_v40, 3  ;;  %v426_v52 = vsel %vm418_vm14, %v943_v41, %v947_v49  ;;  %vm419_vm1 = vcmp.lt.s32.totalorder %v941_v40, 2 }
  0xa5   :  { %v129_v35 = vadd.s32 %v128_v21, %v118_v5  ;;  %v151_v37 = vadd.s32 %v150_v34, %v140_v31  ;;  %v427_v44 = vsel %vm421_vm15, %v414_v25, 920167782  ;;  %v430_v57 = vsel %vm418_vm14, %v947_v49, %v959_v13 }
  0xa6   :  { %v428_v55 = vsel %vm420_vm0, %v959_v13, %v427_v44  ;;  %v99_v59 = vsel %vm93_vm7, %v96_v38, %v98_v39  ;;  %v431_v62 = vsel %vm421_vm15, %v417_v36, 1326507024  ;;  %v436_v1 = vshrl.u32 %v881_v45, 16 }
  0xa7   :  { %v984_v46 = vadd.s32 %v129_v35, %v120_v8  ;;  %v152_v61 = vadd.s32 %v151_v37, %v142_v32  ;;  %v429_v47 = vsel %vm419_vm1, %v426_v52, %v428_v55  ;;  %v432_v0 = vsel %vm420_vm0, %v414_v25, %v431_v62 }
  0xa8   :  { %v459_v53 = vand.u32 65535, %v429_v47  ;;  %v433_v39 = vsel %vm419_vm1, %v430_v57, %v432_v0  ;;  %v460_v4 = vshrl.u32 %v429_v47, 16  ;;  %v224_v5 = vand.u32 2139095040, %v884_v48 }
  0xa9   :  { %vm155_vm2 = vc.u32 %v984_v46, %v973_v33  ;;  %v156_v38 = vadd.s32 1, %v152_v61  ;;  %v153_v7 = vmul.u32 %v877_v42, %v99_v59  ;;  %v402_v22 = vshrl.u32 %v801_v54, %v910_v11 }
  0xaa   :  { %v437_v8 = vand.u32 65535, %v433_v39  ;;  %v438_v9 = vshrl.u32 %v433_v39, 16  ;;  %v462_v12 = vmul.u32 %v460_v4, %v899_v58  ;;  %v463_v14 = vmul.u32 %v459_v53, %v436_v1 }
  0xab   :  { %v157_v10 = vsel %vm155_vm2, %v156_v38, %v152_v61  ;;  %v422_v16 = vsel %vm418_vm14, %v402_v22, %v943_v41  ;;  %v461_v51 = vmul.u32 %v459_v53, %v899_v58  ;;  %v464_v42 = vmul.u32 %v460_v4, %v436_v1 }
  0xac   :  { %v158_v15 = vadd.s32 %v157_v10, %v153_v7  ;;  %v440_v17 = vmul.u32 %v438_v9, %v899_v58  ;;  %v441_v50 = vmul.u32 %v437_v8, %v436_v1  ;;  %v465_v18 = vshll.u32 %v462_v12, 16 }
  0xad   :  { %v225_v19 = vshrl.u32 %v224_v5, 23  ;;  %v439_v20 = vmul.u32 %v437_v8, %v899_v58  ;;  %v442_v21 = vmul.u32 %v438_v9, %v436_v1  ;;  %v467_v29 = vshll.u32 %v463_v14, 16 }
  0xae   :  { %v159_v11 = vadd.s32 536870912, %v158_v15  ;;  %v443_v23 = vshll.u32 %v440_v17, 16  ;;  %v445_v25 = vshll.u32 %v441_v50, 16  ;;  %vm469_vm3 = vc.u32 %v461_v51, %v465_v18 }
  0xaf   :  { %v471_v31 = vadd.s32 %v465_v18, %v461_v51  ;;  %v470_v34 = vsel %vm469_vm3, 1, %v800_v2  ;;  %v423_v35 = vsel %vm421_vm15, %v959_v13, 2102212464  ;;  %v466_v57 = vshrl.u32 %v462_v12, 16 }
  0xb0   :  { %v1019_v32 = vshrl.u32 %v159_v11, 30  ;;  %vm447_vm4 = vc.u32 %v439_v20, %v443_v23  ;;  %v449_v41 = vadd.s32 %v443_v23, %v439_v20  ;;  %v472_v37 = vadd.s32 %v470_v34, %v464_v42 }
  0xb1   :  { %v448_v36 = vsel %vm447_vm4, 1, %v800_v2  ;;  %vm473_vm5 = vc.u32 %v471_v31, %v467_v29  ;;  %v746_v61 = vadd.s32 4294967169, %v225_v19  ;;  %v424_v13 = vsel %vm420_vm0, %v947_v49, %v423_v35 }
  0xb2   :  { %v161_v58 = vshll.u32 %v1019_v32, 30  ;;  %v450_v52 = vadd.s32 %v448_v36, %v442_v21  ;;  %vm451_vm6 = vc.u32 %v449_v41, %v445_v25  ;;  %v474_v44 = vsel %vm473_vm5, 1, %v800_v2 }
  0xb3   :  { %v452_v55 = vsel %vm451_vm6, 1, %v800_v2  ;;  %v476_v59 = vadd.s32 %v474_v44, %v472_v37  ;;  %v444_v62 = vshrl.u32 %v440_v17, 16  ;;  %v468_v1 = vshrl.u32 %v463_v14, 16 }
  0xb4   :  { %v1029_v47 = vsub.s32 %v158_v15, %v161_v58  ;;  %v454_v0 = vadd.s32 %v452_v55, %v450_v52  ;;  %v231_v38 = vadd.s32 1, %v746_v61  ;;  %v446_v4 = vshrl.u32 %v441_v50, 16 }
  0xb5   :  { %v477_v53 = vadd.s32 %v476_v59, %v466_v57  ;;  %v425_v7 = vsel %vm419_vm1, %v422_v16, %v424_v13  ;;  %v221_v8 = vand.u32 2147483647, %v884_v48  ;;  %v1042_v10 = vadd.s32 %v471_v31, %v467_v29 }
  0xb6   :  { %vm163_vm7 = vcmp.lt.s32.totalorder %v1029_v47, 0  ;;  %v164_v39 = vsub.s32 0, %v1029_v47  ;;  %v455_v5 = vadd.s32 %v454_v0, %v444_v62  ;;  %vm232_vm8 = vcmp.gt.s32.totalorder %v231_v38, 0 }
  0xb7   :  { %v478_v22 = vadd.s32 %v477_v53, %v468_v1  ;;  %v233_v12 = vsel %vm232_vm8, %v231_v38, 0  ;;  %v479_v50 = vmul.u32 %v881_v45, %v425_v7  ;;  %v228_v51 = vand.u32 8388607, %v221_v8 }
  0xb8   :  { %v165_v49 = vsel %vm163_vm7, %v164_v39, %v1029_v47  ;;  %v1040_v9 = vadd.s32 %v455_v5, %v446_v4  ;;  %v235_v17 = vand.u32 31, %v233_v12  ;;  %v1061_v31 = vshrl.u32 %v233_v12, 5 }
  0xb9   :  { %v166_v14 = vclz %v165_v49  ;;  %v482_v15 = vadd.s32 1, %v478_v22  ;;  %v229_v29 = vor.u32 8388608, %v228_v51  ;;  %vm62_vm7 = vcmp.lt.s32.totalorder %v864_v26, 0 }
  0xba   :  { %vm481_vm9 = vc.u32 %v1040_v9, %v1042_v10  ;;  %v1049_v42 = vsub.s32 32, %v235_v17  ;;  %v238_v19 = vshll.u32 %v801_v54, %v235_v17  ;;  %v241_v21 = vshll.u32 %v802_v56, %v235_v17 }
  0xbb   :  { %v744_v40 = vadd.s32 4294967294, %v166_v14  ;;  %v483_v16 = vsel %vm481_vm9, %v482_v15, %v478_v22  ;;  %v247_v41 = vshll.u32 %v804_v63, %v235_v17  ;;  %v244_v37 = vshll.u32 %v803_v60, %v235_v17 }
  0xbc   :  { %v484_v18 = vadd.s32 %v483_v16, %v479_v50  ;;  %v239_v11 = vshrl.u32 %v802_v56, %v1049_v42  ;;  %v242_v20 = vshrl.u32 %v803_v60, %v1049_v42  ;;  %v245_v23 = vshrl.u32 %v804_v63, %v1049_v42 }
  0xbd   :  { %v248_v25 = vshrl.u32 %v805_v3, %v1049_v42  ;;  %vm745_vm10 = vcmp.lt.s32.totalorder %v744_v40, 0  ;;  %v250_v52 = vshll.u32 %v805_v3, %v235_v17  ;;  %v251_v44 = vshrl.u32 %v806_v6, %v1049_v42 }
  0xbe   :  { %v485_v45 = vadd.s32 536870912, %v484_v18  ;;  %v1066_v35 = vor.u32 %v239_v11, %v238_v19  ;;  %v1068_v36 = vor.u32 %v242_v20, %v241_v21  ;;  %v1074_v55 = vsel %vm745_vm10, 0, %v744_v40 }
  0xbf   :  { %v249_v58 = vor.u32 %v248_v25, %v247_v41  ;;  %v1077_v59 = vor.u32 %v245_v23, %v244_v37  ;;  %v252_v61 = vor.u32 %v251_v44, %v250_v52  ;;  %vm253_vm11 = vcmp.lt.s32.totalorder %v1061_v31, 1 }
  0xc0   :  { %v1064_v34 = vshrl.u32 %v485_v45, 30  ;;  %vm256_vm12 = vcmp.lt.s32.totalorder %v1061_v31, 4  ;;  %v261_v62 = vsel %vm253_vm11, %v1066_v35, %v1068_v36  ;;  %v1087_v0 = vshll.u32 %v229_v29, 8 }
  0xc1   :  { %v174_v1 = vsub.s32 4294967266, %v1074_v55  ;;  %vm255_vm13 = vcmp.lt.s32.totalorder %v1061_v31, 3  ;;  %v262_v53 = vsel %vm256_vm12, %v249_v58, 920167782  ;;  %vm254_vm14 = vcmp.lt.s32.totalorder %v1061_v31, 2 }
  0xc2   :  { %v487_v57 = vshll.u32 %v1064_v34, 30  ;;  %v263_v39 = vsel %vm255_vm13, %v1077_v59, %v262_v53  ;;  %v265_v5 = vsel %vm253_vm11, %v1068_v36, %v1077_v59  ;;  %v266_v7 = vsel %vm256_vm12, %v252_v61, 1326507024 }
  0xc3   :  { %v264_v4 = vsel %vm254_vm14, %v261_v62, %v263_v39  ;;  %v267_v22 = vsel %vm255_vm13, %v249_v58, %v266_v7  ;;  %v270_v49 = vand.u32 65535, %v1087_v0  ;;  %v175_v14 = vadd.s32 127, %v174_v1 }
  0xc4   :  { %v1080_v13 = vsub.s32 %v484_v18, %v487_v57  ;;  %v295_v12 = vshrl.u32 %v264_v4, 16  ;;  %v268_v15 = vsel %vm254_vm14, %v265_v5, %v267_v22  ;;  %v271_v17 = vshrl.u32 %v1087_v0, 16 }
  0xc5   :  { %v272_v40 = vand.u32 65535, %v268_v15  ;;  %v273_v16 = vshrl.u32 %v268_v15, 16  ;;  %v294_v18 = vand.u32 65535, %v264_v4  ;;  %v170_v20 = vsub.s32 32, %v1074_v55 }
  0xc6   :  { %v490_v38 = vsub.s32 0, %v1080_v13  ;;  %vm489_vm15 = vcmp.lt.s32.totalorder %v1080_v13, 0  ;;  %v297_v51 = vmul.u32 %v295_v12, %v270_v49  ;;  %v176_v45 = vshll.u32 %v175_v14, 23 }
  0xc7   :  { %v275_v19 = vmul.u32 %v273_v16, %v270_v49  ;;  %v276_v11 = vmul.u32 %v272_v40, %v271_v17  ;;  %v154_v23 = vadd.s32 %v973_v33, %v984_v46  ;;  %v274_v25 = vmul.u32 %v272_v40, %v270_v49 }
  0xc8   :  { %v491_v50 = vsel %vm489_vm15, %v490_v38, %v1080_v13  ;;  %v300_v41 = vshll.u32 %v297_v51, 16  ;;  %v171_v37 = vshll.u32 %v1029_v47, %v1074_v55  ;;  %v296_v58 = vmul.u32 %v294_v18, %v270_v49 }
  0xc9   :  { %v492_v21 = vclz %v491_v50  ;;  %v278_v29 = vshll.u32 %v275_v19, 16  ;;  %v298_v52 = vmul.u32 %v294_v18, %v271_v17  ;;  %v1121_v44 = vmul.f32 %v862_v24, %v879_v43 }
  0xca   :  { %v277_v57 = vmul.u32 %v273_v16, %v271_v17  ;;  %v280_v61 = vshll.u32 %v276_v11, 16  ;;  %v172_v1 = vshrl.u32 %v154_v23, %v170_v20  ;;  %v177_v53 = vor.u32 4788187, %v176_v45 }
  0xcb   :  { %vm282_vm0 = vc.u32 %v274_v25, %v278_v29  ;;  %v284_v62 = vadd.s32 %v278_v29, %v274_v25  ;;  %v750_v38 = vadd.s32 4294967294, %v492_v21  ;;  %v299_v39 = vmul.u32 %v295_v12, %v271_v17 }
  0xcc   :  { %v283_v33 = vsel %vm282_vm0, 1, %v800_v2  ;;  %vm304_vm2 = vc.u32 %v296_v58, %v300_v41  ;;  %v279_v47 = vshrl.u32 %v275_v19, 16  ;;  %v302_v4 = vshll.u32 %v298_v52, 16 }
  0xcd   :  { %v285_v46 = vadd.s32 %v283_v33, %v277_v57  ;;  %vm286_vm1 = vc.u32 %v284_v62, %v280_v61  ;;  %v305_v24 = vsel %vm304_vm2, 1, %v800_v2  ;;  %v306_v5 = vadd.s32 %v300_v41, %v296_v58 }
  0xce   :  { %v287_v55 = vsel %vm286_vm1, 1, %v800_v2  ;;  %v307_v7 = vadd.s32 %v305_v24, %v299_v39  ;;  %v545_v22 = vand.u32 2139095040, %v1121_v44  ;;  %v173_v49 = vor.u32 %v172_v1, %v171_v37 }
  0xcf   :  { %v289_v43 = vadd.s32 %v287_v55, %v285_v46  ;;  %vm751_vm3 = vcmp.lt.s32.totalorder %v750_v38, 0  ;;  %v542_v14 = vand.u32 2147483647, %v1121_v44  ;;  %v258_v12 = vsel %vm256_vm12, %v1077_v59, 2102212464 }
  0xd0   :  { %vm308_vm4 = vc.u32 %v306_v5, %v302_v4  ;;  %v546_v17 = vshrl.u32 %v545_v22, 23  ;;  %v178_v50 = vand.u32 2147483647, %v177_v53  ;;  %v237_v40 = vshrl.u32 %v801_v54, %v1049_v42 }
  0xd1   :  { %v290_v15 = vadd.s32 %v289_v43, %v279_v47  ;;  %v281_v16 = vshrl.u32 %v276_v11, 16  ;;  %v309_v18 = vsel %vm308_vm4, 1, %v800_v2  ;;  %v1134_v19 = vsel %vm751_vm3, 0, %v750_v38 }
  0xd2   :  { %v301_v20 = vshrl.u32 %v297_v51, 16  ;;  %v311_v45 = vadd.s32 %v309_v18, %v307_v7  ;;  %v752_v21 = vadd.s32 4294967169, %v546_v17  ;;  %v180_v23 = vcvt.s32.f32 %v173_v49 }
  0xd3   :  { %v257_v59 = vsel %vm253_vm11, %v237_v40, %v1066_v35  ;;  %v259_v25 = vsel %vm255_vm13, %v1068_v36, %v258_v12  ;;  %v1142_v29 = vadd.s32 %v290_v15, %v281_v16  ;;  %v303_v42 = vshrl.u32 %v298_v52, 16 }
  0xd4   :  { %v312_v11 = vadd.s32 %v311_v45, %v301_v20  ;;  %v552_v41 = vadd.s32 1, %v752_v21  ;;  %v181_v37 = vmul.f32 %v180_v23, %v178_v50  ;;  %v500_v58 = vsub.s32 4294967266, %v1134_v19 }
  0xd5   :  { %v1145_v51 = vadd.s32 %v306_v5, %v302_v4  ;;  %v260_v57 = vsel %vm254_vm14, %v257_v59, %v259_v25  ;;  %v549_v35 = vand.u32 8388607, %v542_v14  ;;  %v480_v52 = vadd.s32 %v1042_v10, %v1040_v9 }
  0xd6   :  { %v313_v61 = vadd.s32 %v312_v11, %v303_v42  ;;  %vm553_vm5 = vcmp.gt.s32.totalorder %v552_v41, 0  ;;  %v182_v53 = vxor.u32 2147483648, %v181_v37  ;;  %v496_v31 = vsub.s32 32, %v1134_v19 }
  0xd7   :  { %vm316_vm6 = vc.u32 %v1142_v29, %v1145_v51  ;;  %v554_v36 = vsel %vm553_vm5, %v552_v41, 0  ;;  %v501_v38 = vadd.s32 127, %v500_v58  ;;  %v314_v33 = vmul.u32 %v1087_v0, %v260_v57 }
  0xd8   :  { %v317_v62 = vadd.s32 1, %v313_v61  ;;  %v556_v1 = vand.u32 31, %v554_v36  ;;  %v550_v39 = vor.u32 8388608, %v549_v35  ;;  %v1158_v47 = vshrl.u32 %v554_v36, 5 }
  0xd9   :  { %vm1169_vm8 = vcmp.le.f32.partialorder %v60_v28, 0.7853982  ;;  %v183_v18 = vsel %vm62_vm7, %v182_v53, %v181_v37  ;;  %v497_v20 = vshll.u32 %v1080_v13, %v1134_v19  ;;  %v498_v19 = vshrl.u32 %v480_v52, %v496_v31 }
  0xda   :  { %v318_v46 = vsel %vm316_vm6, %v317_v62, %v313_v61  ;;  %v557_v55 = vsub.s32 32, %v556_v1  ;;  %v559_v24 = vshll.u32 %v801_v54, %v556_v1  ;;  %v562_v43 = vshll.u32 %v802_v56, %v556_v1 }
  0xdb   :  { %v319_v4 = vadd.s32 %v318_v46, %v314_v33  ;;  %v565_v9 = vshll.u32 %v803_v60, %v556_v1  ;;  %v568_v0 = vshll.u32 %v804_v63, %v556_v1  ;;  %v571_v15 = vshll.u32 %v805_v3, %v556_v1 }
  0xdc   :  { %v560_v10 = vshrl.u32 %v802_v56, %v557_v55  ;;  %v563_v5 = vshrl.u32 %v803_v60, %v557_v55  ;;  %v566_v7 = vshrl.u32 %v804_v63, %v557_v55  ;;  %v569_v12 = vshrl.u32 %v805_v3, %v557_v55 }
  0xdd   :  { %v320_v49 = vadd.s32 536870912, %v319_v4  ;;  %v572_v17 = vshrl.u32 %v806_v6, %v557_v55  ;;  %v502_v56 = vshll.u32 %v501_v38, 23  ;;  %vm574_vm9 = vcmp.lt.s32.totalorder %v1158_v47, 1 }
  0xde   :  { %v1176_v50 = vor.u32 %v560_v10, %v559_v24  ;;  %v1178_v60 = vor.u32 %v563_v5, %v562_v43  ;;  %v1180_v40 = vor.u32 %v566_v7, %v565_v9  ;;  %v570_v28 = vor.u32 %v569_v12, %v568_v0 }
  0xdf   :  { %v1182_v63 = vshrl.u32 %v320_v49, 30  ;;  %v573_v16 = vor.u32 %v572_v17, %v571_v15  ;;  %vm577_vm10 = vcmp.lt.s32.totalorder %v1158_v47, 4  ;;  %v1192_v6 = vshll.u32 %v550_v39, 8 }
  0xe0   :  { %v582_v3 = vsel %vm574_vm9, %v1176_v50, %v1178_v60  ;;  %vm576_vm11 = vcmp.lt.s32.totalorder %v1158_v47, 3  ;;  %v583_v21 = vsel %vm577_vm10, %v570_v28, 920167782  ;;  %vm575_vm12 = vcmp.lt.s32.totalorder %v1158_v47, 2 }
  0xe1   :  { %v322_v45 = vshll.u32 %v1182_v63, 30  ;;  %v584_v23 = vsel %vm576_vm11, %v1180_v40, %v583_v21  ;;  %v586_v59 = vsel %vm574_vm9, %v1178_v60, %v1180_v40  ;;  %v587_v13 = vsel %vm577_vm10, %v573_v16, 1326507024 }
  0xe2   :  { %v1210_v25 = vor.u32 4788187, %v502_v56  ;;  %v585_v11 = vsel %vm575_vm12, %v582_v3, %v584_v23  ;;  %v588_v41 = vsel %vm576_vm11, %v570_v28, %v587_v13  ;;  %v591_v37 = vand.u32 65535, %v1192_v6 }
  0xe3   :  { %v323_v42 = vsub.s32 %v319_v4, %v322_v45  ;;  %v615_v58 = vand.u32 65535, %v585_v11  ;;  %v616_v57 = vshrl.u32 %v585_v11, 16  ;;  %v589_v35 = vsel %vm575_vm12, %v586_v59, %v588_v41 }
  0xe4   :  { %v592_v36 = vshrl.u32 %v1192_v6, 16  ;;  %v1223_v52 = vsel %vm1169_vm8, %v864_v26, %v183_v18  ;;  %v593_v62 = vand.u32 65535, %v589_v35  ;;  %v594_v1 = vshrl.u32 %v589_v35, 16 }
  0xe5   :  { %vm324_vm13 = vcmp.lt.s32.totalorder %v323_v42, 0  ;;  %v325_v61 = vsub.s32 0, %v323_v42  ;;  %v618_v53 = vmul.u32 %v616_v57, %v591_v37  ;;  %v499_v31 = vor.u32 %v498_v19, %v497_v20 }
  0xe6   :  { %v504_v38 = vand.u32 2147483647, %v1210_v25  ;;  %v619_v46 = vmul.u32 %v615_v58, %v592_v36  ;;  %v315_v39 = vadd.s32 %v1145_v51, %v1142_v29  ;;  %v596_v24 = vmul.u32 %v594_v1, %v591_v37 }
  0xe7   :  { %v326_v33 = vsel %vm324_vm13, %v325_v61, %v323_v42  ;;  %v597_v43 = vmul.u32 %v593_v62, %v592_v36  ;;  %v558_v9 = vshrl.u32 %v801_v54, %v557_v55  ;;  %v617_v10 = vmul.u32 %v615_v58, %v591_v37 }
  0xe8   :  { %v327_v4 = vclz %v326_v33  ;;  %v620_v5 = vmul.u32 %v616_v57, %v592_v36  ;;  %v621_v7 = vshll.u32 %v618_v53, 16  ;;  %v595_v49 = vmul.u32 %v593_v62, %v591_v37 }
  0xe9   :  { %v598_v12 = vmul.u32 %v594_v1, %v592_v36  ;;  %v599_v15 = vshll.u32 %v596_v24, 16  ;;  %v601_v17 = vshll.u32 %v597_v43, 16  ;;  %v623_v56 = vshll.u32 %v619_v46, 16 }
  0xea   :  { %v747_v0 = vadd.s32 4294967294, %v327_v4  ;;  %vm625_vm14 = vc.u32 %v617_v10, %v621_v7  ;;  %v627_v28 = vadd.s32 %v621_v7, %v617_v10  ;;  %v579_v20 = vsel %vm577_vm10, %v1180_v40, 2102212464 }
  0xeb   :  { %vm603_vm0 = vc.u32 %v595_v49, %v599_v15  ;;  %v605_v16 = vadd.s32 %v599_v15, %v595_v49  ;;  %v626_v29 = vsel %vm625_vm14, 1, %v800_v2  ;;  %v622_v23 = vshrl.u32 %v618_v53, 16 }
  0xec   :  { %vm748_vm15 = vcmp.lt.s32.totalorder %v747_v0, 0  ;;  %v604_v18 = vsel %vm603_vm0, 1, %v800_v2  ;;  %v628_v54 = vadd.s32 %v626_v29, %v620_v5  ;;  %vm629_vm1 = vc.u32 %v627_v28, %v623_v56 }
  0xed   :  { %v330_v51 = vsel %vm748_vm15, 0, %v747_v0  ;;  %v606_v45 = vadd.s32 %v604_v18, %v598_v12  ;;  %vm607_vm2 = vc.u32 %v605_v16, %v601_v17  ;;  %v630_v59 = vsel %vm629_vm1, 1, %v800_v2 }
  0xee   :  { %v331_v55 = vsub.s32 32, %v330_v51  ;;  %v335_v3 = vsub.s32 4294967266, %v330_v51  ;;  %v332_v21 = vshll.u32 %v323_v42, %v330_v51  ;;  %v608_v25 = vsel %vm607_vm2, 1, %v800_v2 }
  0xef   :  { %v632_v11 = vadd.s32 %v630_v59, %v628_v54  ;;  %v578_v41 = vsel %vm574_vm9, %v558_v9, %v1176_v50  ;;  %v580_v37 = vsel %vm576_vm11, %v1178_v60, %v579_v20  ;;  %v600_v40 = vshrl.u32 %v596_v24, 16 }
  0xf0   :  { %v333_v13 = vshrl.u32 %v315_v39, %v331_v55  ;;  %v336_v19 = vadd.s32 127, %v335_v3  ;;  %v610_v58 = vadd.s32 %v608_v25, %v606_v45  ;;  %v624_v61 = vshrl.u32 %v619_v46, 16 }
  0xf1   :  { %v633_v35 = vadd.s32 %v632_v11, %v622_v23  ;;  %v602_v36 = vshrl.u32 %v597_v43, 16  ;;  %v506_v1 = vcvt.s32.f32 %v499_v31  ;;  %v581_v2 = vsel %vm575_vm12, %v578_v41, %v580_v37 }
  0xf2   :  { %v334_v42 = vor.u32 %v333_v13, %v332_v21  ;;  %v337_v57 = vshll.u32 %v336_v19, 23  ;;  %v611_v62 = vadd.s32 %v610_v58, %v600_v40  ;;  %v188_v50 = vmul.f32 %v1223_v52, %v1223_v52 }
  0xf3   :  { %v634_v33 = vadd.s32 %v633_v35, %v624_v61  ;;  %v1248_v60 = vadd.s32 %v627_v28, %v623_v56  ;;  %v507_v4 = vmul.f32 %v506_v1, %v504_v38  ;;  %v635_v43 = vmul.u32 %v1192_v6, %v581_v2 }
  0xf4   :  { %v338_v53 = vor.u32 4788187, %v337_v57  ;;  %v1246_v39 = vadd.s32 %v611_v62, %v602_v36  ;;  %v341_v9 = vcvt.s32.f32 %v334_v42  ;;  %v184_v10 = vsub.s32 4, %v1019_v32 }
  0xf5   :  { %v638_v46 = vadd.s32 1, %v634_v33  ;;  %v189_v7 = vmul.f32 -0.001358992, %v188_v50  ;;  %v196_v0 = vmul.f32 -0.00019511016, %v188_v50  ;;  %v508_v49 = vxor.u32 2147483648, %v507_v4 }
  0xf6   :  { %v339_v24 = vand.u32 2147483647, %v338_v53  ;;  %vm637_vm3 = vc.u32 %v1246_v39, %v1248_v60  ;;  %v345_v15 = vsub.s32 4, %v1182_v63  ;;  %vm223_vm4 = vcmp.lt.s32.totalorder %v884_v48, 0 }
  0xf7   :  { %v639_v47 = vsel %vm637_vm3, %v638_v46, %v634_v33  ;;  %v190_v17 = vadd.f32 0.041655596, %v189_v7  ;;  %v197_v56 = vadd.f32 0.008332121, %v196_v0  ;;  %vm388_vm5 = vcmp.lt.s32.totalorder %v867_v27, 0 }
  0xf8   :  { %v342_v31 = vmul.f32 %v341_v9, %v339_v24  ;;  %v640_v5 = vadd.s32 %v639_v47, %v635_v43  ;;  %vm1259_vm6 = vcmp.le.f32.partialorder %v221_v8, 0.7853982  ;;  %v185_v16 = vsel %vm62_vm7, %v184_v10, %v1019_v32 }
  0xf9   :  { %v191_v18 = vmul.f32 %v190_v17, %v188_v50  ;;  %v198_v54 = vmul.f32 %v197_v56, %v188_v50  ;;  %v509_v55 = vsel %vm388_vm5, %v508_v49, %v507_v4  ;;  %v346_v8 = vsel %vm223_vm4, %v345_v15, %v1182_v63 }
  0xfa   :  { %v343_v12 = vxor.u32 2147483648, %v342_v31  ;;  %v641_v38 = vadd.s32 536870912, %v640_v5  ;;  %v187_v45 = vsel %vm1169_vm8, 0, %v185_v16  ;;  %vm1279_vm7 = vcmp.le.f32.partialorder %v386_v30, 0.7853982 }
  0xfb   :  { %v192_v32 = vadd.f32 -0.4999988, %v191_v18  ;;  %v199_v21 = vadd.f32 -0.16666654, %v198_v54  ;;  %v1286_v13 = vsel %vm1279_vm7, %v867_v27, %v509_v55  ;;  %v204_v11 = vadd.s32 3, %v187_v45 }
  0xfc   :  { %v344_v28 = vsel %vm223_vm4, %v343_v12, %v342_v31  ;;  %v1269_v51 = vshrl.u32 %v641_v38, 30  ;;  %v348_v22 = vsel %vm1259_vm6, 0, %v346_v8  ;;  %v1292_v57 = vmul.f32 %v1286_v13, %v1286_v13 }
  0xfd   :  { %v347_v29 = vsel %vm1259_vm6, %v884_v48, %v344_v28  ;;  %v200_v19 = vmul.f32 %v199_v21, %v188_v50  ;;  %v193_v30 = vmul.f32 %v192_v32, %v188_v50  ;;  %v365_v36 = vadd.s32 3, %v348_v22  ;;  %v770_v32 = vld [vmem:[%s1346_s4] ss:$0 sm:$0xff] }
  0xfe   :  { %v349_v3 = vmul.f32 %v347_v29, %v347_v29  ;;  %v643_v20 = vshll.u32 %v1269_v51, 30  ;;  %v205_v53 = vand.u32 3, %v204_v11  ;;  %v522_v43 = vmul.f32 -0.00019511016, %v1292_v57 }
  0xff   :  { %v201_v40 = vadd.f32 1.0, %v200_v19  ;;  %v194_v33 = vadd.f32 1.0, %v193_v30  ;;  %v366_v46 = vand.u32 3, %v365_v36  ;;  %v636_v7 = vadd.s32 %v1248_v60, %v1246_v39  ;;  %v1300_v60 = vpop.permute.xlu1 %707 }
 0x100   :  { %v357_v59 = vmul.f32 -0.00019511016, %v349_v3  ;;  %v644_v63 = vsub.s32 %v640_v5, %v643_v20  ;;  %v350_v41 = vmul.f32 -0.001358992, %v349_v3  ;;  %vm206_vm10 = vcmp.lt.s32.totalorder %v205_v53, 2 }
 0x101   :  { %v202_v35 = vmul.f32 %v201_v40, %v1223_v52  ;;  %vm207_vm11 = vcmp.eq.s32.totalorder %v205_v53, 0  ;;  %vm210_vm12 = vcmp.eq.s32.totalorder %v205_v53, 2  ;;  %v211_v52 = vxor.u32 2147483648, %v194_v33 }
 0x102   :  { %v358_v25 = vadd.f32 0.008332121, %v357_v59  ;;  %vm645_vm8 = vcmp.lt.s32.totalorder %v644_v63, 0  ;;  %v646_v37 = vsub.s32 0, %v644_v63  ;;  %v351_v42 = vadd.f32 0.041655596, %v350_v41 }
 0x103   :  { %v208_v50 = vxor.u32 2147483648, %v202_v35  ;;  %vm368_vm13 = vcmp.eq.s32.totalorder %v366_v46, 0  ;;  %v523_v38 = vadd.f32 0.008332121, %v522_v43  ;;  %v212_v16 = vsel %vm210_vm12, %v211_v52, %v202_v35 }
 0x104   :  { %v359_v58 = vmul.f32 %v358_v25, %v349_v3  ;;  %v647_v61 = vsel %vm645_vm8, %v646_v37, %v644_v63  ;;  %v352_v2 = vmul.f32 %v351_v42, %v349_v3  ;;  %vm371_vm14 = vcmp.eq.s32.totalorder %v366_v46, 2 }
 0x105   :  { %v648_v1 = vclz %v647_v61  ;;  %v209_v12 = vsel %vm207_vm11, %v194_v33, %v208_v50  ;;  %v515_v54 = vmul.f32 -0.001358992, %v1292_v57  ;;  %vm203_vm15 = vweird.f32 %v864_v26 }
 0x106   :  { %v360_v62 = vadd.f32 -0.16666654, %v359_v58  ;;  %v353_v9 = vadd.f32 -0.4999988, %v352_v2  ;;  %v213_v8 = vsel %vm206_vm10, %v209_v12, %v212_v16  ;;  %vm367_vm0 = vcmp.lt.s32.totalorder %v366_v46, 2 }
 0x107   :  { %v753_v24 = vadd.s32 4294967294, %v648_v1  ;;  %vm364_vm1 = vweird.f32 %v884_v48  ;;  %v524_v21 = vmul.f32 %v523_v38, %v1292_v57  ;;  %v214_v59 = vsel %vm203_vm15, nan, %v213_v8  ;;  %v716_v61 = vpop.permute.xlu1 %715 }
 0x108   :  { %v361_v4 = vmul.f32 %v360_v62, %v349_v3  ;;  %v354_v47 = vmul.f32 %v353_v9, %v349_v3  ;;  %v516_v22 = vadd.f32 0.041655596, %v515_v54  ;;  %v510_v30 = vsub.s32 4, %v1064_v34 }
 0x109   :  { %vm754_vm9 = vcmp.lt.s32.totalorder %v753_v24, 0  ;;  %v525_v37 = vadd.f32 -0.16666654, %v524_v21  ;;  %vm703_vm2 = vcmask 261120   ;;  %vm711_vm3 = vcmask 64512  }
 0x10a   :  { %v362_v31 = vadd.f32 1.0, %v361_v4  ;;  %v651_v10 = vsel %vm754_vm9, 0, %v753_v24  ;;  %v355_v15 = vadd.f32 1.0, %v354_v47  ;;  %v517_v58 = vmul.f32 %v516_v22, %v1292_v57 }
 0x10b   :  { %v652_v0 = vsub.s32 32, %v651_v10  ;;  %v656_v49 = vsub.s32 4294967266, %v651_v10  ;;  %v653_v17 = vshll.u32 %v644_v63, %v651_v10  ;;  %v808_v42 = vmov 0.0  }
 0x10c   :  { %v363_v5 = vmul.f32 %v362_v31, %v347_v29  ;;  %v372_v18 = vxor.u32 2147483648, %v355_v15  ;;  %704 = vst.msk [vmem:[#allocation2] sm:$0xff] %vm703_vm2, %v808_v42  ;;  %vm718_vm4 = vcmask 72768   ;;  %vm544_vm6 = vcmp.lt.s32.totalorder %v1121_v44, 0 }
 0x10d   :  { %v654_v56 = vshrl.u32 %v636_v7, %v652_v0  ;;  %v657_v6 = vadd.s32 127, %v656_v49  ;;  %vm1314_vm8 = vcmp.le.f32.partialorder %v542_v14, 0.7853982  ;;  %v526_v62 = vmul.f32 %v525_v37, %v1292_v57 }
 0x10e   :  { %v369_v28 = vxor.u32 2147483648, %v363_v5  ;;  %v373_v3 = vsel %vm371_vm14, %v372_v18, %v363_v5  ;;  %v666_v1 = vsub.s32 4, %v1269_v51  ;;  %v511_v2 = vsel %vm388_vm5, %v510_v30, %v1064_v34 }
 0x10f   :  { %v655_v55 = vor.u32 %v654_v56, %v653_v17  ;;  %v658_v29 = vshll.u32 %v657_v6, 23  ;;  %v518_v14 = vadd.f32 -0.4999988, %v517_v58  ;;  %v513_v24 = vsel %vm1279_vm7, 0, %v511_v2 }
 0x110   :  { %v370_v39 = vsel %vm368_vm13, %v355_v15, %v369_v28  ;;  %v527_v9 = vadd.f32 1.0, %v526_v62  ;;  %v667_v46 = vsel %vm544_vm6, %v666_v1, %v1269_v51  ;;  %v530_v10 = vadd.s32 3, %v513_v24 }
 0x111   :  { %v659_v20 = vor.u32 4788187, %v658_v29  ;;  %v374_v45 = vsel %vm367_vm0, %v370_v39, %v373_v3  ;;  %v662_v25 = vcvt.s32.f32 %v655_v55  ;;  %v519_v31 = vmul.f32 %v518_v14, %v1292_v57 }
 0x112   :  { %v375_v63 = vsel %vm364_vm1, nan, %v374_v45  ;;  %v528_v5 = vmul.f32 %v527_v9, %v1286_v13  ;;  %v669_v34 = vsel %vm1314_vm8, 0, %v667_v46  ;;  %v531_v12 = vand.u32 3, %v530_v10 }
 0x113   :  { %v660_v19 = vand.u32 2147483647, %v659_v20  ;;  %v376_v11 = vsub.f32 %v214_v59, %v375_v63  ;;  %v520_v49 = vadd.f32 1.0, %v519_v31  ;;  %v686_v15 = vadd.s32 3, %v669_v34  ;;  %v771_v20 = vld [vmem:[%s1347_s5] ss:$0 sm:$0xff] }
 0x114   :  { %v534_v17 = vxor.u32 2147483648, %v528_v5  ;;  %vm533_vm5 = vcmp.eq.s32.totalorder %v531_v12, 0  ;;  %vm536_vm7 = vcmp.eq.s32.totalorder %v531_v12, 2  ;;  %vm532_vm9 = vcmp.lt.s32.totalorder %v531_v12, 2 }
 0x115   :  { %v663_v41 = vmul.f32 %v662_v25, %v660_v19  ;;  %v381_v26 = vmul.f32 %v770_v32, %v376_v11  ;;  %v537_v6 = vxor.u32 2147483648, %v520_v49  ;;  %v687_v28 = vand.u32 3, %v686_v15 }
 0x116   :  { %v535_v18 = vsel %vm533_vm5, %v520_v49, %v534_v17  ;;  %vm529_vm13 = vweird.f32 %v867_v27  ;;  %vm685_vm14 = vweird.f32 %v1121_v44  ;;  %vm725_vm15 = vcmask 138312  }
 0x117   :  { %v664_v48 = vxor.u32 2147483648, %v663_v41  ;;  %v710_v40 = vmul.f32 %v1300_v60, %v381_v26  ;;  %v538_v54 = vsel %vm536_vm7, %v537_v6, %v528_v5  ;;  %vm689_vm10 = vcmp.eq.s32.totalorder %v687_v28, 0 }
 0x118   :  { %v539_v29 = vsel %vm532_vm9, %v535_v18, %v538_v54  ;;  %vm692_vm11 = vcmp.eq.s32.totalorder %v687_v28, 2  ;;  %vm688_vm12 = vcmp.lt.s32.totalorder %v687_v28, 2 }
 0x119   :  { %v665_v36 = vsel %vm544_vm6, %v664_v48, %v663_v41  ;;  %712 = vst.msk [vmem:[#allocation2] sm:$0xff] %vm711_vm3, %v710_v40  ;;  %v540_v45 = vsel %vm529_vm13, nan, %v539_v29 }
 0x11a   :  { %v668_v53 = vsel %vm1314_vm8, %v1121_v44, %v665_v36  ;;  %719 = vst.msk [vmem:[#allocation2] sm:$0xff] %vm718_vm4, %v716_v61 }
 0x11b   :  { %v670_v33 = vmul.f32 %v668_v53, %v668_v53 }
 0x11d   :  { %v678_v4 = vmul.f32 -0.00019511016, %v670_v33  ;;  %v671_v50 = vmul.f32 -0.001358992, %v670_v33 }
 0x11f   :  { %v679_v43 = vadd.f32 0.008332121, %v678_v4  ;;  %v672_v47 = vadd.f32 0.041655596, %v671_v50 }
 0x121   :  { %v680_v52 = vmul.f32 %v679_v43, %v670_v33  ;;  %v673_v7 = vmul.f32 %v672_v47, %v670_v33 }
 0x123   :  { %v681_v0 = vadd.f32 -0.16666654, %v680_v52  ;;  %v674_v23 = vadd.f32 -0.4999988, %v673_v7 }
 0x125   :  { %v682_v38 = vmul.f32 %v681_v0, %v670_v33  ;;  %v675_v51 = vmul.f32 %v674_v23, %v670_v33 }
 0x127   :  { %v683_v56 = vadd.f32 1.0, %v682_v38  ;;  %v676_v57 = vadd.f32 1.0, %v675_v51 }
 0x129   :  { %v684_v16 = vmul.f32 %v683_v56, %v668_v53  ;;  %v693_v13 = vxor.u32 2147483648, %v676_v57 }
 0x12b   :  { %v690_v55 = vxor.u32 2147483648, %v684_v16  ;;  %v694_v39 = vsel %vm692_vm11, %v693_v13, %v684_v16 }
 0x12d   :  { %v691_v8 = vsel %vm689_vm10, %v676_v57, %v690_v55 }
 0x12e   :  { %v695_v3 = vsel %vm688_vm12, %v691_v8, %v694_v39 }
 0x12f   :  { %v696_v32 = vsel %vm685_vm14, nan, %v695_v3 }
 0x130   :  { %v697_v21 = vsub.f32 %v540_v45, %v696_v32 }
 0x132   :  { %v702_v59 = vmul.f32 %v771_v20, %v697_v21 }
 0x134   :  { %v720_v63 = vmul.f32 %v1300_v60, %v702_v59 }
 0x136   :  { %722 = vrot.lane.b32.xlu2 %v720_v63, %s809_s29 }
 0x190   :  { %v723_v27 = vpop.permute.xlu2 %722 }
 0x191   :  { %726 = vst.msk [vmem:[#allocation2] sm:$0xff] %vm725_vm15, %v723_v27 }
 0x192   :  { %737 = dma.vmem_to_hbm [thread:$0]  %s733_s7, 128, %s735_s10, [#allocation3]  }
 0x193   :  { %798 = dma.done.wait [#allocation3], 128  }
 0x194   :  { %799 = vsyncadd [#allocation3], 4294967168 }
 0x195   :  { %742 = vsyncpa [#allocation3], 1 }

</bundles_post_ra>
